<compile_context>
chip_gen: v6e
topology: v6e:2x2x1
jax: 0.10.0
libtpu: 0.0.40
codegen_flags: <defaults>
</compile_context>

<pallas_src>
import functools

import jax
import jax.numpy as jnp
from jax.experimental import pallas as pl
from jax.experimental.pallas import tpu as pltpu

HIDDEN = 64


def _round_up(x, m):
    return ((x + m - 1) // m) * m


def _bf16_elementwise_ok():
    """bf16 VPU/EUP exists on v6e/v7x; on v5e (and older) bf16 elementwise ops
    lower to convert + f32 and are a net loss, so keep activations in f32."""
    try:
        kind = jax.devices()[0].device_kind.lower()
    except Exception:
        return False
    return not any(t in kind for t in ("v2", "v3", "v4", "v5"))


# ---------------------------------------------------------------------------
# Kernel
# ---------------------------------------------------------------------------
def critic_kernel(s_ref, w1_ref, b1_ref, w2_ref, b2_ref, w3_ref, b3_ref,
                  out_ref, *, act_dtype):
    # s_ref : [num_states, TILE_B] (mxu dtype)   -- batch on lanes
    # w1_ref: [64, num_states], w2_ref: [64, 64] (mxu dtype)
    # b1/b2 : [64, 1] act_dtype ; w3_ref: [64, 1] f32 ; b3_ref: [1, 1] f32
    # out   : [1, TILE_B] f32

    # fc1 + tanh : [64, ns] @ [ns, TILE_B] -> [64, TILE_B], f32 MXU accumulate,
    # bias add + tanh in act_dtype (bf16 on v6e/v7x, f32 on v5e).
    x1 = jnp.dot(w1_ref[...], s_ref[...], preferred_element_type=jnp.float32)
    h1 = jnp.tanh(x1.astype(act_dtype) + b1_ref[...])

    # fc2 + tanh : [64, 64] @ [64, TILE_B] -> [64, TILE_B]
    x2 = jnp.dot(w2_ref[...], h1.astype(w2_ref.dtype),
                 preferred_element_type=jnp.float32)
    h2 = jnp.tanh(x2.astype(act_dtype) + b2_ref[...])

    # fc3 as VPU multiply + sublane reduce (f32): sum_k h2[k,b] * w3[k] + b3
    out_ref[...] = (
        jnp.sum(h2.astype(jnp.float32) * w3_ref[...], axis=0, keepdims=True)
        + b3_ref[...]
    )


# ---------------------------------------------------------------------------
# Wrappers
# ---------------------------------------------------------------------------
def critic_forward_transposed(s_t, params, *, tile_b=4096,
                              mxu_dtype=jnp.bfloat16, act_dtype=None):
    """s_t: [num_states, B] -> value [B, 1] f32.

    Preferred entry point for a real RL loop: states produced pre-transposed
    upstream, so there is no wrapper-side transpose (extra HBM pass) here.
    """
    w1, b1, w2, b2, w3, b3 = params
    num_states, B = s_t.shape

    if act_dtype is None:
        use_bf16_act = (jnp.dtype(mxu_dtype) == jnp.dtype(jnp.bfloat16)
                        and _bf16_elementwise_ok())
        act_dtype = jnp.bfloat16 if use_bf16_act else jnp.float32

    # Lane-dense batch tiling: big tiles amortize per-step grid overhead and
    # give the MXU a large N; VMEM at tile_b=4096 is only a few MiB.
    b_pad128 = _round_up(B, 128)
    tile_b = _round_up(min(tile_b, b_pad128), 128)
    # v7x megacore: guarantee >= 2 grid steps so the "parallel" batch axis can
    # shard across the two TensorCores (negligible cost on v5e/v6e).
    if b_pad128 // tile_b < 2 and b_pad128 >= 256:
        tile_b = _round_up(b_pad128 // 2, 128)
    b_pad = _round_up(B, tile_b)
    grid = (b_pad // tile_b,)

    s_p = s_t
    if b_pad != B:
        s_p = jnp.pad(s_t, ((0, 0), (0, b_pad - B)))
    s_p = s_p.astype(mxu_dtype)

    # Transposed weight layout (y^T = W @ x^T); biases/fc3 weight as columns.
    w1_t = w1.T.astype(mxu_dtype)                       # [64, num_states]
    w2_t = w2.T.astype(mxu_dtype)                       # [64, 64]
    b1_c = b1.reshape(HIDDEN, 1).astype(act_dtype)
    b2_c = b2.reshape(HIDDEN, 1).astype(act_dtype)
    w3_c = w3.reshape(HIDDEN, 1).astype(jnp.float32)
    b3_c = b3.reshape(1, 1).astype(jnp.float32)

    kernel = functools.partial(critic_kernel, act_dtype=act_dtype)

    out = pl.pallas_call(
        kernel,
        out_shape=jax.ShapeDtypeStruct((1, b_pad), jnp.float32),
        grid=grid,
        in_specs=[
            # streamed batch tiles (default double-buffering is sufficient)
            pl.BlockSpec((num_states, tile_b), lambda i: (0, i)),
            # weights/biases: constant index_map -> VMEM-resident across steps
            pl.BlockSpec((HIDDEN, num_states), lambda i: (0, 0)),
            pl.BlockSpec((HIDDEN, 1), lambda i: (0, 0)),
            pl.BlockSpec((HIDDEN, HIDDEN), lambda i: (0, 0)),
            pl.BlockSpec((HIDDEN, 1), lambda i: (0, 0)),
            pl.BlockSpec((HIDDEN, 1), lambda i: (0, 0)),
            pl.BlockSpec((1, 1), lambda i: (0, 0)),
        ],
        out_specs=pl.BlockSpec((1, tile_b), lambda i: (0, i)),
        compiler_params=pltpu.CompilerParams(
            dimension_semantics=("parallel",),
            vmem_limit_bytes=32 * 1024 * 1024,
        ),
    )(s_p, w1_t, b1_c, w2_t, b2_c, w3_c, b3_c)

    return out[0, :B].reshape(B, 1)


def critic_forward(s, params, *, tile_b=4096, mxu_dtype=jnp.bfloat16,
                   act_dtype=None, min_pallas_batch=1024, force_pallas=False):
    """s: [B, num_states] float32 -> value: [B, 1] float32."""
    B = s.shape[0]
    # Tiny batches: a standalone Pallas call is pure fixed overhead; let XLA
    # run the three small GEMMs directly (or fuse into the surrounding kernel).
    if B < min_pallas_batch and not force_pallas:
        return reference_forward(s, params)
    # NOTE: this transpose is an extra HBM pass over s; in a real RL loop
    # produce the states pre-transposed and call critic_forward_transposed.
    return critic_forward_transposed(s.T, params, tile_b=tile_b,
                                     mxu_dtype=mxu_dtype, act_dtype=act_dtype)


# ---------------------------------------------------------------------------
# Params / reference
# ---------------------------------------------------------------------------
def init_params(key, num_states):
    """PyTorch Linear default init: U[-1/sqrt(fan_in), +1/sqrt(fan_in)]."""
    def linear(key, fan_in, fan_out):
        kw, kb = jax.random.split(key)
        bound = 1.0 / jnp.sqrt(jnp.float32(fan_in))
        w = jax.random.uniform(kw, (fan_in, fan_out), jnp.float32, -bound, bound)
        b = jax.random.uniform(kb, (fan_out,), jnp.float32, -bound, bound)
        return w, b

    k1, k2, k3 = jax.random.split(key, 3)
    w1, b1 = linear(k1, num_states, HIDDEN)
    w2, b2 = linear(k2, HIDDEN, HIDDEN)
    w3, b3 = linear(k3, HIDDEN, 1)
    return (w1, b1, w2, b2, w3, b3)


def reference_forward(s, params):
    w1, b1, w2, b2, w3, b3 = params
    h1 = jnp.tanh(s @ w1 + b1)
    h2 = jnp.tanh(h1 @ w2 + b2)
    return h2 @ w3 + b3


# ---------------------------------------------------------------------------
# Demo / self-test
# ---------------------------------------------------------------------------
if __name__ == "__main__":
    key = jax.random.PRNGKey(0)
    k_params, k_s1, k_s2 = jax.random.split(key, 3)

    num_states = 16
    params = init_params(k_params, num_states)

    # (1) Small batch forced through the Pallas path, exact f32 everywhere.
    s_small = jax.random.normal(k_s1, (8, num_states), jnp.float32)
    ref_small = reference_forward(s_small, params)
    v_small = critic_forward(s_small, params, mxu_dtype=jnp.float32,
                             act_dtype=jnp.float32, force_pallas=True)
    jax.block_until_ready(v_small)
    assert v_small.shape == (8, 1)
    assert jnp.allclose(v_small, ref_small, atol=1e-4, rtol=1e-4), \
        "f32 Pallas path mismatch vs reference"

    # (2) Multi-tile grid (>= 2 steps) with the default fast path (bf16 MXU,
    #     bf16 activations on v6e/v7x, f32 activations on v5e).
    s_mid = jax.random.normal(k_s2, (384, num_states), jnp.float32)
    ref_mid = reference_forward(s_mid, params)
    v_mid = critic_forward(s_mid, params, force_pallas=True)
    jax.block_until_ready(v_mid)
    assert v_mid.shape == (384, 1)
    assert jnp.allclose(v_mid, ref_mid, atol=5e-2, rtol=5e-2), \
        "bf16 Pallas path mismatch vs reference"

    # (3) Dispatch path: tiny batch stays on plain XLA (no Pallas overhead).
    v_xla = critic_forward(s_small, params)
    jax.block_until_ready(v_xla)
    assert jnp.allclose(v_xla, ref_small, atol=1e-5, rtol=1e-5), \
        "XLA bypass path mismatch vs reference"

    print("KERNEL_OK")
</pallas_src>

<mosaic_0001>
module attributes {stable_mosaic.version = 11 : i64} {
  func.func @critic_kernel(%arg0: i32, %arg1: memref<16x128xf32, #tpu.memory_space<vmem>>, %arg2: memref<64x16xf32, #tpu.memory_space<vmem>>, %arg3: memref<64x1xf32, #tpu.memory_space<vmem>>, %arg4: memref<64x64xf32, #tpu.memory_space<vmem>>, %arg5: memref<64x1xf32, #tpu.memory_space<vmem>>, %arg6: memref<64x1xf32, #tpu.memory_space<vmem>>, %arg7: memref<1x1xf32, #tpu.memory_space<vmem>>, %arg8: memref<1x128xf32, #tpu.memory_space<vmem>>) attributes {dimension_semantics = [#tpu.dimension_semantics<parallel>], iteration_bounds = array<i64: 1>, scalar_prefetch = 0 : i64, scratch_operands = 0 : i64, tpu.core_type = #tpu.core_type<tc>, window_params = [{transform_indices = @transform_0, window_bounds = array<i64: 16, 128>}, {pipeline_mode = #tpu.pipeline_mode<synchronous>, transform_indices = @transform_1, window_bounds = array<i64: 64, 16>}, {pipeline_mode = #tpu.pipeline_mode<synchronous>, transform_indices = @transform_2, window_bounds = array<i64: 64, 1>}, {pipeline_mode = #tpu.pipeline_mode<synchronous>, transform_indices = @transform_3, window_bounds = array<i64: 64, 64>}, {pipeline_mode = #tpu.pipeline_mode<synchronous>, transform_indices = @transform_4, window_bounds = array<i64: 64, 1>}, {pipeline_mode = #tpu.pipeline_mode<synchronous>, transform_indices = @transform_5, window_bounds = array<i64: 64, 1>}, {pipeline_mode = #tpu.pipeline_mode<synchronous>, transform_indices = @transform_6, window_bounds = array<i64: 1, 1>}, {transform_indices = @transform_7, window_bounds = array<i64: 1, 128>}]} {
    %c0 = arith.constant 0 : index
    %c0_0 = arith.constant 0 : index
    %0 = vector.load %arg2[%c0, %c0_0] : memref<64x16xf32, #tpu.memory_space<vmem>>, vector<64x16xf32>
    %c0_1 = arith.constant 0 : index
    %c0_2 = arith.constant 0 : index
    %1 = vector.load %arg1[%c0_1, %c0_2] : memref<16x128xf32, #tpu.memory_space<vmem>>, vector<16x128xf32>
    %cst = arith.constant dense<0.000000e+00> : vector<64x128xf32>
    %2 = tpu.matmul %0, %1, %cst {dimension_numbers = #tpu.dot_dimension_numbers<[1], [0], [0], [1], [0, 0, 1, 1], [], []>} : vector<64x16xf32>, vector<16x128xf32>, vector<64x128xf32> -> vector<64x128xf32>
    %c0_3 = arith.constant 0 : index
    %c0_4 = arith.constant 0 : index
    %3 = vector.load %arg3[%c0_3, %c0_4] : memref<64x1xf32, #tpu.memory_space<vmem>>, vector<64x1xf32>
    %4 = vector.broadcast %3 : vector<64x1xf32> to vector<64x128xf32>
    %5 = arith.addf %2, %4 : vector<64x128xf32>
    %6 = math.tanh %5 : vector<64x128xf32>
    %c0_5 = arith.constant 0 : index
    %c0_6 = arith.constant 0 : index
    %7 = vector.load %arg4[%c0_5, %c0_6] : memref<64x64xf32, #tpu.memory_space<vmem>>, vector<64x64xf32>
    %cst_7 = arith.constant dense<0.000000e+00> : vector<64x128xf32>
    %8 = tpu.matmul %7, %6, %cst_7 {dimension_numbers = #tpu.dot_dimension_numbers<[1], [0], [0], [1], [0, 0, 1, 1], [], []>} : vector<64x64xf32>, vector<64x128xf32>, vector<64x128xf32> -> vector<64x128xf32>
    %c0_8 = arith.constant 0 : index
    %c0_9 = arith.constant 0 : index
    %9 = vector.load %arg5[%c0_8, %c0_9] : memref<64x1xf32, #tpu.memory_space<vmem>>, vector<64x1xf32>
    %10 = vector.broadcast %9 : vector<64x1xf32> to vector<64x128xf32>
    %11 = arith.addf %8, %10 : vector<64x128xf32>
    %12 = math.tanh %11 : vector<64x128xf32>
    %c0_10 = arith.constant 0 : index
    %c0_11 = arith.constant 0 : index
    %13 = vector.load %arg6[%c0_10, %c0_11] : memref<64x1xf32, #tpu.memory_space<vmem>>, vector<64x1xf32>
    %14 = vector.broadcast %13 : vector<64x1xf32> to vector<64x128xf32>
    %15 = arith.mulf %12, %14 : vector<64x128xf32>
    %cst_12 = arith.constant dense<0.000000e+00> : vector<128xf32>
    %16 = vector.multi_reduction <add>, %15, %cst_12 [0] : vector<64x128xf32> to vector<128xf32>
    %17 = vector.shape_cast %16 : vector<128xf32> to vector<1x128xf32>
    %c0_13 = arith.constant 0 : index
    %c0_14 = arith.constant 0 : index
    %18 = vector.load %arg7[%c0_13, %c0_14] : memref<1x1xf32, #tpu.memory_space<vmem>>, vector<1x1xf32>
    %19 = vector.broadcast %18 : vector<1x1xf32> to vector<1x128xf32>
    %20 = arith.addf %17, %19 : vector<1x128xf32>
    %c0_15 = arith.constant 0 : index
    %c0_16 = arith.constant 0 : index
    %21 = vector.load %arg8[%c0_15, %c0_16] : memref<1x128xf32, #tpu.memory_space<vmem>>, vector<1x128xf32>
    tpu.vector_store %arg8[%c0_15, %c0_16], %20 {strides = array<i32>} : memref<1x128xf32, #tpu.memory_space<vmem>>, vector<1x128xf32>,
    return
  }
  func.func @transform_0(%arg0: i32) -> (i32, i32) {
    %c0_i32 = arith.constant 0 : i32
    %c0_i32_0 = arith.constant 0 : i32
    return %c0_i32, %arg0 : i32, i32
  }
  func.func @transform_1(%arg0: i32) -> (i32, i32) {
    %c0_i32 = arith.constant 0 : i32
    %c0_i32_0 = arith.constant 0 : i32
    %c0_i32_1 = arith.constant 0 : i32
    return %c0_i32, %c0_i32_0 : i32, i32
  }
  func.func @transform_2(%arg0: i32) -> (i32, i32) {
    %c0_i32 = arith.constant 0 : i32
    %c0_i32_0 = arith.constant 0 : i32
    %c0_i32_1 = arith.constant 0 : i32
    return %c0_i32, %c0_i32_0 : i32, i32
  }
  func.func @transform_3(%arg0: i32) -> (i32, i32) {
    %c0_i32 = arith.constant 0 : i32
    %c0_i32_0 = arith.constant 0 : i32
    %c0_i32_1 = arith.constant 0 : i32
    return %c0_i32, %c0_i32_0 : i32, i32
  }
  func.func @transform_4(%arg0: i32) -> (i32, i32) {
    %c0_i32 = arith.constant 0 : i32
    %c0_i32_0 = arith.constant 0 : i32
    %c0_i32_1 = arith.constant 0 : i32
    return %c0_i32, %c0_i32_0 : i32, i32
  }
  func.func @transform_5(%arg0: i32) -> (i32, i32) {
    %c0_i32 = arith.constant 0 : i32
    %c0_i32_0 = arith.constant 0 : i32
    %c0_i32_1 = arith.constant 0 : i32
    return %c0_i32, %c0_i32_0 : i32, i32
  }
  func.func @transform_6(%arg0: i32) -> (i32, i32) {
    %c0_i32 = arith.constant 0 : i32
    %c0_i32_0 = arith.constant 0 : i32
    %c0_i32_1 = arith.constant 0 : i32
    return %c0_i32, %c0_i32_0 : i32, i32
  }
  func.func @transform_7(%arg0: i32) -> (i32, i32) {
    %c0_i32 = arith.constant 0 : i32
    %c0_i32_0 = arith.constant 0 : i32
    return %c0_i32, %arg0 : i32, i32
  }
}

</mosaic_0001>

<bundles_post_ra>
// kernel: tpu_custom_call.1
= control target key start
LH: loop header
LB: loop body
LE: loop exit
PB: predicated region body
PF: predicated region fallthrough
CT: control target
= control target key end

     0   :  { %s864_s0 = inlined_call_operand.vmem [shape: f32[16,128], index: 0, kind: input, shape index: {}]   ;;  %s865_s1 = inlined_call_operand.vmem [shape: f32[64,16], index: 1, kind: input, shape index: {}]   ;;  %s866_s2 = inlined_call_operand.vmem [shape: f32[64,1], index: 2, kind: input, shape index: {}]   ;;  %s867_s3 = inlined_call_operand.vmem [shape: f32[64,64], index: 3, kind: input, shape index: {}]   ;;  %s868_s4 = inlined_call_operand.vmem [shape: f32[64,1], index: 4, kind: input, shape index: {}]   ;;  %s869_s5 = inlined_call_operand.vmem [shape: f32[64,1], index: 5, kind: input, shape index: {}]   ;;  %s870_s6 = inlined_call_operand.<no memory space> [shape: f32[1,1], index: 6, kind: input, shape index: {}]   ;;  %s871_s7 = inlined_call_operand.hbm [shape: f32[1,128], index: 7, kind: output, shape index: {}]  }
   0x1   :  { %v12_v0 = vstv %s870_s6 }
   0x2   :  { %13 = vst [vmem:[#allocation2] sm:$0x1] %v12_v0 }
   0x3   :  { %v38_v1 = vld [vmem:[%s864_s0 + $0x8] sm:$0xff]  ;;  %v37_v2 = vld [vmem:[%s864_s0] sm:$0xff]  ;;  %vm87_vm0 = vcmask 130048   ;;  %v674_v5 = vmov 0   ;;  %v31_v6 = vld [vmem:[%s865_s1 + $0x10] sm:$0xff] }
   0x4   :  { %v29_v3 = vld [vmem:[%s865_s1] sm:$0xff]  ;;  %556 = vmatprep.subr.mxu0 %v38_v1  ;;  %v30_v4 = vld [vmem:[%s865_s1 + $0x8] sm:$0xff]  ;;  %618 = vset.pattern.permute.xlu0 %v674_v5  ;;  %v46_v7 = vld [vmem:[%s866_s2 + $0x38] sm:$0xff] }
   0x5   :  { %560 = vmatprep.mubr.msk.f32.mxu0 %vm87_vm0, %v29_v3  ;;  %557 = vmatpush3.msra.mxu0 %v38_v1  ;;  %v44_v8 = vld [vmem:[%s866_s2 + $0x28] sm:$0xff]  ;;  %v45_v9 = vld [vmem:[%s866_s2 + $0x30] sm:$0xff]  ;;  %v32_v10 = vld [vmem:[%s865_s1 + $0x18] sm:$0xff] }
   0x6   :  { %558 = vmatprep.subr.mxu0 %v37_v2  ;;  %619 = vset.pattern.permute.xlu1 %v674_v5  ;;  %v43_v11 = vld [vmem:[%s866_s2 + $0x20] sm:$0xff]  ;;  %v42_v13 = vld [vmem:[%s866_s2 + $0x18] sm:$0xff]  ;;  %v34_v14 = vld [vmem:[%s865_s1 + $0x28] sm:$0xff] }
   0x7   :  { %559 = vmatpush3.msra.mxu0 %v37_v2  ;;  %84 = vperm.xlu0 %618, %v46_v7   ;;  %v33_v12 = vld [vmem:[%s865_s1 + $0x20] sm:$0xff]  ;;  %v41_v15 = vld [vmem:[%s866_s2 + $0x10] sm:$0xff] }
   0x8   :  { %561 = vmatmul.mubr.msk.f32.vlgmr.msra.gmra.mxu0 %vm87_vm0, %v30_v4  ;;  %74 = vperm.xlu1 %619, %v44_v8   ;;  %v35_v16 = vld [vmem:[%s865_s1 + $0x30] sm:$0xff] }
   0x9   :  { %563 = vmatprep.mubr.msk.f32.mxu0 %vm87_vm0, %v31_v6 }
   0xb   :  { %79 = vperm.xlu0 %618, %v45_v9  }
   0xc   :  { %564 = vmatmul.mubr.msk.f32.gmra.mxu0 %vm87_vm0, %v32_v10  ;;  %69 = vperm.xlu1 %619, %v43_v11  }
   0xd   :  { %566 = vmatprep.mubr.msk.f32.mxu0 %vm87_vm0, %v33_v12 }
   0xe   :  { %14 = vsyncpa [#allocation4], 0  ;;  %v40_v17 = vld [vmem:[%s866_s2 + $0x8] sm:$0xff]  ;;  %v36_v18 = vld [vmem:[%s865_s1 + $0x38] sm:$0xff]  ;;  %vm281_vm1 = vcmask 523264  }
   0xf   :  { %64 = vperm.xlu0 %618, %v42_v13   ;;  %v39_v19 = vld [vmem:[%s866_s2] sm:$0xff]  ;;  %v234_v21 = vld [vmem:[%s868_s4 + $0x8] sm:$0xff]  ;;  %v235_v22 = vld [vmem:[%s868_s4 + $0x10] sm:$0xff] }
  0x10   :  { %567 = vmatmul.mubr.msk.f32.gmra.mxu0 %vm87_vm0, %v34_v14  ;;  %59 = vperm.xlu1 %619, %v41_v15   ;;  %v233_v20 = vld [vmem:[%s868_s4] sm:$0xff]  ;;  %v236_v23 = vld [vmem:[%s868_s4 + $0x18] sm:$0xff]  ;;  %v238_v25 = vld [vmem:[%s868_s4 + $0x28] sm:$0xff] }
  0x11   :  { %569 = vmatprep.mubr.msk.f32.mxu0 %vm87_vm0, %v35_v16  ;;  %v237_v24 = vld [vmem:[%s868_s4 + $0x20] sm:$0xff]  ;;  %v239_v26 = vld [vmem:[%s868_s4 + $0x30] sm:$0xff]  ;;  %v240_v27 = vld [vmem:[%s868_s4 + $0x38] sm:$0xff] }
  0x12   :  { %v419_v28 = vld [vmem:[%s869_s5] sm:$0xff]  ;;  %v420_v29 = vld [vmem:[%s869_s5 + $0x8] sm:$0xff]  ;;  %v421_v30 = vld [vmem:[%s869_s5 + $0x10] sm:$0xff] }
  0x13   :  { %54 = vperm.xlu0 %618, %v40_v17   ;;  %v422_v31 = vld [vmem:[%s869_s5 + $0x18] sm:$0xff]  ;;  %v423_v32 = vld [vmem:[%s869_s5 + $0x20] sm:$0xff]  ;;  %v424_v33 = vld [vmem:[%s869_s5 + $0x28] sm:$0xff] }
  0x14   :  { %570 = vmatmul.mubr.msk.f32.gmra.mxu0 %vm87_vm0, %v36_v18  ;;  %49 = vperm.xlu1 %619, %v39_v19   ;;  %v425_v34 = vld [vmem:[%s869_s5 + $0x30] sm:$0xff]  ;;  %v426_v35 = vld [vmem:[%s869_s5 + $0x38] sm:$0xff]  ;;  %v488_v36 = vld [vmem:[#allocation2] sm:$0x1] }
  0x15   :  { %v225_v37 = vld [vmem:[%s867_s3] sm:$0xff]  ;;  %v227_v38 = vld [vmem:[%s867_s3 + $0x10] sm:$0xff]  ;;  %v226_v7 = vld [vmem:[%s867_s3 + $0x8] sm:$0xff] }
  0x16   :  { %588 = vmatprep.mubr.msk.f32.mxu0 %vm281_vm1, %v225_v37  ;;  %591 = vmatprep.mubr.msk.f32.mxu1 %vm281_vm1, %v227_v38  ;;  %v228_v8 = vld [vmem:[%s867_s3 + $0x18] sm:$0xff]  ;;  %v229_v9 = vld [vmem:[%s867_s3 + $0x20] sm:$0xff]  ;;  %v230_v10 = vld [vmem:[%s867_s3 + $0x28] sm:$0xff] }
  0x17   :  { %243 = vperm.xlu0 %618, %v233_v20   ;;  %v231_v11 = vld [vmem:[%s867_s3 + $0x30] sm:$0xff]  ;;  %v232_v12 = vld [vmem:[%s867_s3 + $0x38] sm:$0xff]  ;;  %s675_s3 = smov [#allocation3]  }
  0x18   :  { %248 = vperm.xlu1 %619, %v234_v21   ;;  %s506_s29 = sshll.u32 %s675_s3, 4  ;;  %s507_s29 = int_to_ptr.vmem [resolvable:$true] %s506_s29 }
  0x19   :  { %s652_s30 = scalar_lea.vmem %s507_s29, 16  ;;  %s656_s8 = scalar_lea.vmem %s507_s29, 32 }
  0x1a   :  { %p653_p0 = scmp.ne.s32.totalorder %s507_s29, %s652_s30  ;;  %p657_p1 = scmp.lt.s32.totalorder %s507_s29, %s507_s29 }
  0x1b   :  { %253 = vperm.xlu0 %618, %v235_v22   ;;  %p658_p2 = scmp.lt.s32.totalorder %s656_s8, %s652_s30 }
  0x1c   :  { %258 = vperm.xlu1 %619, %v236_v23  }
  0x1d   :  { %p659_p3 = por %p658_p2, %p657_p1 }
  0x1f   :  { %263 = vperm.xlu0 %618, %v237_v24   ;;  %p660_p4 = pnand %p659_p3, %p653_p0 }
  0x20   :  { %268 = vperm.xlu1 %619, %v238_v25  }
  0x23   :  { %273 = vperm.xlu0 %618, %v239_v26  }
  0x24   :  { %278 = vperm.xlu1 %619, %v240_v27  }
  0x27   :  { %429 = vperm.xlu0 %618, %v419_v28  }
  0x28   :  { %434 = vperm.xlu1 %619, %v420_v29  }
  0x2b   :  { %439 = vperm.xlu0 %618, %v421_v30  }
  0x2c   :  { %444 = vperm.xlu1 %619, %v422_v31  }
  0x2f   :  { %449 = vperm.xlu0 %618, %v423_v32  }
  0x30   :  { %454 = vperm.xlu1 %619, %v424_v33  }
  0x33   :  { %459 = vperm.xlu0 %618, %v425_v34  }
  0x34   :  { %464 = vperm.xlu1 %619, %v426_v35  }
  0x37   :  { %491 = vperm.xlu0 %618, %v488_v36  }
  0x82   :  { %v85_v41 = vpop.permute.xlu0 %84 }
  0x83   :  { %v75_v43 = vpop.permute.xlu1 %74 }
  0x86   :  { %v80_v46 = vpop.permute.xlu0 %79 }
  0x87   :  { %v70_v48 = vpop.permute.xlu1 %69 }
  0x8a   :  { %v65_v54 = vpop.permute.xlu0 %64 }
  0x8b   :  { %v60_v56 = vpop.permute.xlu1 %59 }
  0x8e   :  { %v55_v59 = vpop.permute.xlu0 %54 }
  0x8f   :  { %v50_v61 = vpop.permute.xlu1 %49 }
  0x92   :  { %v244_v13 = vpop.permute.xlu0 %243 }
  0x93   :  { %v249_v14 = vpop.permute.xlu1 %248 }
  0x96   :  { %v254_v15 = vpop.permute.xlu0 %253 }
  0x97   :  { %v259_v16 = vpop.permute.xlu1 %258 }
  0x9a   :  { %v264_v17 = vpop.permute.xlu0 %263 }
  0x9b   :  { %v269_v18 = vpop.permute.xlu1 %268 }
  0x9e   :  { %v274_v27 = vpop.permute.xlu0 %273 }
  0x9f   :  { %v279_v29 = vpop.permute.xlu1 %278 }
  0xa2   :  { %v430_v34 = vpop.permute.xlu0 %429 }
  0xa3   :  { %v435_v38 = vpop.permute.xlu1 %434 }
  0xc8   :  { %v562_v39 = vpop.f32.mrf.mxu0 }
  0xc9   :  { %v184_v60 = vadd.f32 %v562_v39, %v55_v59 }
  0xca   :  { %v178_v40 = vpop.f32.mrf.mxu0 }
  0xcb   :  { %v179_v62 = vadd.f32 %v178_v40, %v50_v61  ;;  %v440_v40 = vpop.permute.xlu0 %439 }
  0xcc   :  { %v565_v42 = vpop.f32.mrf.mxu0 }
  0xcd   :  { %v194_v57 = vadd.f32 %v565_v42, %v65_v54  ;;  %v445_v42 = vpop.permute.xlu1 %444 }
  0xce   :  { %v188_v44 = vpop.f32.mrf.mxu0 }
  0xcf   :  { %v189_v58 = vadd.f32 %v188_v44, %v60_v56 }
  0xd0   :  { %v568_v45 = vpop.f32.mrf.mxu0 }
  0xd1   :  { %v204_v52 = vadd.f32 %v568_v45, %v75_v43  ;;  %v455_v54 = vpop.permute.xlu1 %454 }
  0xd2   :  { %v198_v47 = vpop.f32.mrf.mxu0 }
  0xd3   :  { %v199_v55 = vadd.f32 %v198_v47, %v70_v48 }
  0xd4   :  { %v571_v49 = vpop.f32.mrf.mxu0 }
  0xd5   :  { %v214_v50 = vadd.f32 %v571_v49, %v85_v41 }
  0xd6   :  { %v208_v51 = vpop.f32.mrf.mxu0 }
  0xd7   :  { %620 = vtanh.f32 %v214_v50  ;;  %v209_v53 = vadd.f32 %v208_v51, %v80_v46  ;;  %v450_v50 = vpop.permute.xlu0 %449 }
  0xd9   :  { %622 = vtanh.f32 %v209_v53 }
  0xda   :  { %624 = vtanh.f32 %v204_v52 }
  0xdb   :  { %626 = vtanh.f32 %v199_v55  ;;  %v460_v61 = vpop.permute.xlu0 %459 }
  0xdc   :  { %628 = vtanh.f32 %v194_v57 }
  0xdd   :  { %630 = vtanh.f32 %v189_v58 }
  0xde   :  { %632 = vtanh.f32 %v184_v60 }
  0xdf   :  { %634 = vtanh.f32 %v179_v62 }
  0xe4   :  { %v621_v63 = vpop.eup %620 }
  0xe5   :  { %572 = vmatprep.subr.mxu0 %v621_v63  ;;  %600 = vmatprep.subr.mxu1 %v621_v63 }
  0xe6   :  { %v623_v0 = vpop.eup %622  ;;  %573 = vmatpush3.msra.mxu0 %v621_v63  ;;  %608 = vmatpush3.msra.mxu1 %v621_v63 }
  0xe7   :  { %574 = vmatprep.subr.mxu0 %v623_v0  ;;  %601 = vmatprep.subr.mxu1 %v623_v0  ;;  %v625_v1 = vpop.eup %624 }
  0xe8   :  { %575 = vmatpush3.msra.mxu0 %v623_v0  ;;  %609 = vmatpush3.msra.mxu1 %v623_v0  ;;  %v627_v2 = vpop.eup %626  ;;  %v465_v0 = vpop.permute.xlu1 %464 }
  0xe9   :  { %576 = vmatprep.subr.mxu0 %v625_v1  ;;  %602 = vmatprep.subr.mxu1 %v625_v1  ;;  %v629_v3 = vpop.eup %628 }
  0xea   :  { %577 = vmatpush3.msra.mxu0 %v625_v1  ;;  %610 = vmatpush3.msra.mxu1 %v625_v1  ;;  %v631_v4 = vpop.eup %630 }
  0xeb   :  { %578 = vmatprep.subr.mxu0 %v627_v2  ;;  %603 = vmatprep.subr.mxu1 %v627_v2  ;;  %v633_v5 = vpop.eup %632 }
  0xec   :  { %579 = vmatpush3.msra.mxu0 %v627_v2  ;;  %611 = vmatpush3.msra.mxu1 %v627_v2  ;;  %v635_v6 = vpop.eup %634 }
  0xed   :  { %580 = vmatprep.subr.mxu0 %v629_v3  ;;  %604 = vmatprep.subr.mxu1 %v629_v3 }
  0xee   :  { %581 = vmatpush3.msra.mxu0 %v629_v3  ;;  %612 = vmatpush3.msra.mxu1 %v629_v3  ;;  %v494_v3 = vlaneseq }
  0xef   :  { %582 = vmatprep.subr.mxu0 %v631_v4  ;;  %605 = vmatprep.subr.mxu1 %v631_v4 }
  0xf0   :  { %583 = vmatpush3.msra.mxu0 %v631_v4  ;;  %613 = vmatpush3.msra.mxu1 %v631_v4 }
  0xf1   :  { %584 = vmatprep.subr.mxu0 %v633_v5  ;;  %606 = vmatprep.subr.mxu1 %v633_v5 }
  0xf2   :  { %585 = vmatpush3.msra.mxu0 %v633_v5  ;;  %614 = vmatpush3.msra.mxu1 %v633_v5 }
  0xf3   :  { %586 = vmatprep.subr.mxu0 %v635_v6  ;;  %607 = vmatprep.subr.mxu1 %v635_v6 }
  0xf4   :  { %587 = vmatpush3.msra.mxu0 %v635_v6  ;;  %615 = vmatpush3.msra.mxu1 %v635_v6  ;;  %v495_v6 = vshrl.u32 %v494_v3, 7 }
  0xf5   :  { %589 = vmatmul.mubr.msk.f32.vlgmr.msra.gmra.mxu0 %vm281_vm1, %v226_v7  ;;  %592 = vmatmul.mubr.msk.f32.vlgmr.msra.gmra.mxu1 %vm281_vm1, %v228_v8 }
  0xf6   :  { %594 = vmatprep.mubr.msk.f32.mxu1 %vm281_vm1, %v229_v9  ;;  %v496_v9 = vsub.s32 0, %v495_v6 }
  0xf9   :  { %595 = vmatmul.mubr.msk.f32.gmra.mxu1 %vm281_vm1, %v230_v10 }
  0xfa   :  { %597 = vmatprep.mubr.msk.f32.mxu1 %vm281_vm1, %v231_v11  ;;  %v492_v11 = vpop.permute.xlu0 %491 }
  0xfd   :  { %598 = vmatmul.mubr.msk.f32.gmra.mxu1 %vm281_vm1, %v232_v12 }
 0x1b5   :  { %v590_v19 = vpop.f32.mrf.mxu0  ;;  %v593_v20 = vpop.f32.mrf.mxu1 }
 0x1b6   :  { %v378_v21 = vadd.f32 %v590_v19, %v249_v14  ;;  %v388_v24 = vadd.f32 %v593_v20, %v259_v16 }
 0x1b7   :  { %v372_v22 = vpop.f32.mrf.mxu0  ;;  %v382_v23 = vpop.f32.mrf.mxu1 }
 0x1b8   :  { %636 = vtanh.f32 %v378_v21  ;;  %v373_v25 = vadd.f32 %v372_v22, %v244_v13  ;;  %v383_v26 = vadd.f32 %v382_v23, %v254_v15  ;;  %v497_v13 = vrot.slane %v492_v11, %v496_v9 }
 0x1b9   :  { %v596_v28 = vpop.f32.mrf.mxu1 }
 0x1ba   :  { %638 = vtanh.f32 %v373_v25  ;;  %v398_v31 = vadd.f32 %v596_v28, %v269_v18 }
 0x1bb   :  { %640 = vtanh.f32 %v383_v26  ;;  %v392_v30 = vpop.f32.mrf.mxu1 }
 0x1bc   :  { %642 = vtanh.f32 %v388_v24  ;;  %v393_v32 = vadd.f32 %v392_v30, %v264_v17 }
 0x1bd   :  { %v599_v33 = vpop.f32.mrf.mxu1 }
 0x1be   :  { %644 = vtanh.f32 %v393_v32  ;;  %v408_v36 = vadd.f32 %v599_v33, %v279_v29 }
 0x1bf   :  { %v402_v35 = vpop.f32.mrf.mxu1  ;;  %646 = vtanh.f32 %v398_v31 }
 0x1c0   :  { %v403_v37 = vadd.f32 %v402_v35, %v274_v27 }
 0x1c2   :  { %648 = vtanh.f32 %v403_v37 }
 0x1c3   :  { %650 = vtanh.f32 %v408_v36 }
 0x1c5   :  { %v637_v39 = vpop.eup %636 }
 0x1c6   :  { %v468_v44 = vmul.f32 %v637_v39, %v435_v38 }
 0x1c7   :  { %v639_v41 = vpop.eup %638 }
 0x1c8   :  { %v641_v43 = vpop.eup %640  ;;  %v467_v45 = vmul.f32 %v639_v41, %v430_v34 }
 0x1c9   :  { %v643_v46 = vpop.eup %642  ;;  %v469_v48 = vmul.f32 %v641_v43, %v440_v40 }
 0x1ca   :  { %v475_v47 = vadd.f32 %v468_v44, %v467_v45  ;;  %v470_v51 = vmul.f32 %v643_v46, %v445_v42 }
 0x1cb   :  { %v645_v49 = vpop.eup %644 }
 0x1cc   :  { %v476_v52 = vadd.f32 %v475_v47, %v469_v48  ;;  %v647_v53 = vpop.eup %646  ;;  %v471_v55 = vmul.f32 %v645_v49, %v450_v50 }
 0x1cd   :  { %v472_v58 = vmul.f32 %v647_v53, %v455_v54 }
 0x1ce   :  { %v477_v56 = vadd.f32 %v476_v52, %v470_v51 }
 0x1cf   :  { %v649_v57 = vpop.eup %648 }
 0x1d0   :  { %v478_v59 = vadd.f32 %v477_v56, %v471_v55  ;;  %v651_v60 = vpop.eup %650  ;;  %v473_v62 = vmul.f32 %v649_v57, %v460_v61 }
 0x1d1   :  { %v474_v1 = vmul.f32 %v651_v60, %v465_v0 }
 0x1d2   :  { %v479_v63 = vadd.f32 %v478_v59, %v472_v58 }
 0x1d4   :  { %v480_v2 = vadd.f32 %v479_v63, %v473_v62 }
 0x1d6   :  { %v481_v4 = vadd.f32 %v480_v2, %v474_v1 }
 0x1d8   :  { %v482_v5 = vrot.slane %v481_v4, 4 }
 0x1da   :  { %v483_v7 = vadd.f32 %v482_v5, %v481_v4 }
 0x1dc   :  { %v484_v8 = vrot.slane %v483_v7, 2 }
 0x1de   :  { %v485_v10 = vadd.f32 %v484_v8, %v483_v7 }
 0x1e0   :  { %v486_v12 = vrot.slane %v485_v10, 1 }
 0x1e2   :  { %v487_v14 = vadd.f32 %v486_v12, %v485_v10 }
 0x1e4   :  { %v498_v15 = vadd.f32 %v497_v13, %v487_v14 }
 0x1e6   :  { %499 = vst [vmem:[#allocation3] sm:$0x1] %v498_v15 }
 0x1e7   :  { %663 = shalt.err (!%p660_p4)
}
 0x1e8   :  { %509 = dma.vmem_to_hbm [thread:$0]  %s507_s29, 16, %s871_s7, [#allocation4]  }
 0x1e9   :  { %672 = dma.done.wait [#allocation4], 16  }
 0x1ea   :  { %673 = vsyncadd [#allocation4], 4294967280 }
 0x1eb   :  { %513 = vsyncpa [#allocation4], 1 }

</bundles_post_ra>
